<compile_context>
chip_gen: v6e
topology: v6e:2x2x1
jax: 0.10.0
libtpu: 0.0.40
codegen_flags: <defaults>
</compile_context>

<pallas_src>
import functools

import jax
import jax.numpy as jnp
from jax.experimental import pallas as pl
from jax.experimental.pallas import tpu as pltpu


# ----------------------------- kernel ----------------------------------------


def _mha_fused_kernel(x_ref, wqkv_ref, wproj_ref, b_ref, o_ref, kv_ref,
                      *, n_head, q_tile, seq_len):
    """Fused causal MHA + output projection for one (batch, query-tile) block.

    x_ref    : (T, C)   full sequence of x for this batch (VMEM block)
    wqkv_ref : (C, 3C)  packed, pre-transposed [Wq^T | Wk^T | Wv^T], bf16
    wproj_ref: (C, C)   pre-transposed output-projection weight, bf16
    b_ref    : (1, C)   output-projection bias, f32
    o_ref    : (q_tile, C) lane-dense output rows
    kv_ref   : (T, 2C)  bf16 VMEM scratch holding [K | V], cached per batch
    """
    C = x_ref.shape[-1]
    T = seq_len
    hs = C // n_head
    scale = hs ** (-0.5)

    # --- K/V projection: computed once per batch, cached across query tiles ---
    @pl.when(pl.program_id(1) == 0)
    def _():
        x_full = x_ref[...].astype(jnp.bfloat16)                       # (T, C)
        kv = jnp.dot(x_full, wqkv_ref[:, C:],
                     preferred_element_type=jnp.float32)               # (T, 2C)
        kv_ref[...] = kv.astype(jnp.bfloat16)

    # --- Q projection for this query tile only (rows sliced from resident x) ---
    q0 = pl.multiple_of(pl.program_id(1) * q_tile, q_tile)
    x_q = x_ref[pl.ds(q0, q_tile), :].astype(jnp.bfloat16)             # (tq, C)
    q_all = jnp.dot(x_q, wqkv_ref[:, :C],
                    preferred_element_type=jnp.float32) * scale        # (tq, C)
    q_all = q_all.astype(jnp.bfloat16)

    # Causal mask with this tile's global query-row offset.
    rows = q0 + jax.lax.broadcasted_iota(jnp.int32, (q_tile, T), 0)
    cols = jax.lax.broadcasted_iota(jnp.int32, (q_tile, T), 1)
    causal = cols <= rows

    # Output accumulator; bias folded in up front (broadcast over rows).
    out_acc = jnp.zeros((q_tile, C), jnp.float32) + b_ref[...]

    # Per-head attention; each head's output is folded directly into the
    # projection accumulator via the matching row-block of W_proj^T.
    for h in range(n_head):
        qh = q_all[:, h * hs:(h + 1) * hs]                             # (tq, hs) bf16
        kh = kv_ref[:, h * hs:(h + 1) * hs]                            # (T,  hs) bf16
        vh = kv_ref[:, C + h * hs:C + (h + 1) * hs]                    # (T,  hs) bf16

        # q @ k^T without materializing a transpose (contract head dims).
        s = jax.lax.dot_general(
            qh, kh, (((1,), (1,)), ((), ())),
            preferred_element_type=jnp.float32)                        # (tq, T) f32
        s = jnp.where(causal, s, -jnp.inf)

        # Numerically-stable softmax in f32 (attention dropout = identity in eval).
        m = jnp.max(s, axis=-1, keepdims=True)
        e = jnp.exp(s - m)
        denom = jnp.sum(e, axis=-1, keepdims=True)
        acc = jnp.dot(e.astype(jnp.bfloat16), vh,
                      preferred_element_type=jnp.float32)              # (tq, hs)
        head_out = acc * pl.reciprocal(denom, approx=True)

        out_acc = out_acc + jnp.dot(
            head_out.astype(jnp.bfloat16),
            wproj_ref[h * hs:(h + 1) * hs, :],
            preferred_element_type=jnp.float32)

    # Residual dropout is identity in eval mode.
    o_ref[...] = out_acc.astype(o_ref.dtype)


# ----------------------------- wrapper ----------------------------------------


def multi_head_attention(x, wq, wk, wv, w_proj, b_proj, *, q_tile=None):
    """x: (B, T, C); wq/wk/wv: (H, hs, C) (PyTorch (out,in) per head);
    w_proj: (C, C); b_proj: (C,)."""
    B, T, C = x.shape
    H, hs, _ = wq.shape
    assert H * hs == C

    if q_tile is None:
        q_tile = T if T <= 256 else 256
    if T % q_tile != 0:
        # TODO(synk): pad / ragged last tile; keep exact tiling for now.
        q_tile = T
    n_q = T // q_tile

    # Pack + pre-transpose weights once on the host, stored bf16:
    #   (C, 3C) = [Wq^T | Wk^T | Wv^T], head-major columns inside each block.
    w_qkv = jnp.concatenate(
        [wq.reshape(C, C).T, wk.reshape(C, C).T, wv.reshape(C, C).T],
        axis=1).astype(jnp.bfloat16)
    w_proj_t = w_proj.T.astype(jnp.bfloat16)
    b2 = b_proj.reshape(1, C).astype(jnp.float32)

    kernel = functools.partial(_mha_fused_kernel, n_head=H, q_tile=q_tile,
                               seq_len=T)

    # Explicit VMEM budget derived from the chosen tiles (with headroom).
    itemsize = x.dtype.itemsize
    vmem_est = (
        3 * C * C * 2            # packed QKV weights (bf16, single copy)
        + C * C * 2              # projection weights (bf16, single copy)
        + C * 4                  # bias (f32)
        + 2 * T * C * itemsize   # x block (double-buffered)
        + 2 * q_tile * C * itemsize  # output block (double-buffered)
        + T * 2 * C * 2          # KV scratch (bf16)
        + 4 * q_tile * T * 4     # live score / prob blocks (f32)
    )
    vmem_limit = int(min(100 << 20, max(32 << 20, 3 * vmem_est)))

    out = pl.pallas_call(
        kernel,
        out_shape=jax.ShapeDtypeStruct((B, T, C), x.dtype),
        grid_spec=pltpu.PrefetchScalarGridSpec(
            num_scalar_prefetch=0,
            grid=(B, n_q),
            in_specs=[
                # full sequence of x for this batch; block index constant over
                # the query-tile axis -> only re-DMA'd when the batch changes.
                pl.BlockSpec((None, T, C), lambda b, i: (b, 0, 0)),
                # weights / bias: whole-array VMEM residency, single copy.
                pl.BlockSpec(memory_space=pltpu.MemorySpace.VMEM),
                pl.BlockSpec(memory_space=pltpu.MemorySpace.VMEM),
                pl.BlockSpec(memory_space=pltpu.MemorySpace.VMEM),
            ],
            out_specs=pl.BlockSpec((None, q_tile, C), lambda b, i: (b, i, 0)),
            scratch_shapes=[pltpu.VMEM((T, 2 * C), jnp.bfloat16)],
        ),
        compiler_params=pltpu.CompilerParams(
            # axis 1 must be "arbitrary" so the KV scratch carries across
            # query tiles; batch axis stays "parallel" (megacore on v7x).
            dimension_semantics=("parallel", "arbitrary"),
            vmem_limit_bytes=vmem_limit),
    )(x, w_qkv, w_proj_t, b2)

    return out


# ----------------------------- reference --------------------------------------


def _reference(x, wq, wk, wv, w_proj, b_proj):
    """Plain-JAX f32 reference mirroring the PyTorch forward (eval mode)."""
    B, T, C = x.shape
    H, hs, _ = wq.shape
    q = jnp.einsum("btc,hdc->bhtd", x, wq)
    k = jnp.einsum("btc,hdc->bhtd", x, wk)
    v = jnp.einsum("btc,hdc->bhtd", x, wv)
    wei = jnp.einsum("bhtd,bhsd->bhts", q, k) * (hs ** -0.5)
    mask = jnp.tril(jnp.ones((T, T), dtype=bool))
    wei = jnp.where(mask, wei, -jnp.inf)
    wei = jax.nn.softmax(wei, axis=-1)
    out = jnp.einsum("bhts,bhsd->bhtd", wei, v)
    out = jnp.transpose(out, (0, 2, 1, 3)).reshape(B, T, C)
    return out @ w_proj.T + b_proj


# ----------------------------- main --------------------------------------------


if __name__ == "__main__":
    B, T = 2, 8
    n_embd, n_head = 32, 4
    head_size = n_embd // n_head
    block_size = T  # T <= block_size, so the tril mask is just the causal mask

    key = jax.random.PRNGKey(0)
    kx, kq, kk, kv, kp, kb = jax.random.split(key, 6)

    x = jax.random.normal(kx, (B, T, n_embd), dtype=jnp.float32)

    # deterministic synthetic parameters (nn.Linear-like scaling)
    w_scale = 1.0 / (n_embd ** 0.5)
    wq = jax.random.uniform(kq, (n_head, head_size, n_embd), jnp.float32,
                            -w_scale, w_scale)
    wk = jax.random.uniform(kk, (n_head, head_size, n_embd), jnp.float32,
                            -w_scale, w_scale)
    wv = jax.random.uniform(kv, (n_head, head_size, n_embd), jnp.float32,
                            -w_scale, w_scale)
    w_proj = jax.random.uniform(kp, (n_embd, n_embd), jnp.float32,
                                -w_scale, w_scale)
    b_proj = jax.random.uniform(kb, (n_embd,), jnp.float32, -w_scale, w_scale)

    # TODO(synk): dropout (on attention weights and output) is omitted — the
    # module in eval() mode makes it an identity, which is what we reproduce.

    out = multi_head_attention(x, wq, wk, wv, w_proj, b_proj)
    out = jax.block_until_ready(out)

    ref = _reference(x, wq, wk, wv, w_proj, b_proj)
    assert out.shape == (B, T, n_embd)
    # tolerance accounts for bf16 MXU operands + the EUP approximate reciprocal
    assert jnp.allclose(out, ref, atol=5e-2, rtol=5e-2), "mismatch vs reference"

    print("KERNEL_OK")
</pallas_src>

<mosaic_0001>
module attributes {stable_mosaic.version = 11 : i64} {
  func.func @_mha_fused_kernel(%arg0: i32, %arg1: i32, %arg2: memref<1x8x32xf32, #tpu.memory_space<vmem>>, %arg3: memref<32x96xbf16, #tpu.memory_space<vmem>>, %arg4: memref<32x32xbf16, #tpu.memory_space<vmem>>, %arg5: memref<1x32xf32, #tpu.memory_space<vmem>>, %arg6: memref<1x8x32xf32, #tpu.memory_space<vmem>>, %arg7: memref<8x64xbf16, #tpu.memory_space<vmem>>) attributes {dimension_semantics = [#tpu.dimension_semantics<parallel>, #tpu.dimension_semantics<arbitrary>], iteration_bounds = array<i64: 2, 1>, scalar_prefetch = 0 : i64, scratch_operands = 1 : i64, tpu.core_type = #tpu.core_type<tc>, window_params = [{transform_indices = @transform_0, window_bounds = array<i64: 1, 8, 32>}, {pipeline_mode = #tpu.pipeline_mode<synchronous>, transform_indices = @transform_1, window_bounds = array<i64: 32, 96>}, {pipeline_mode = #tpu.pipeline_mode<synchronous>, transform_indices = @transform_2, window_bounds = array<i64: 32, 32>}, {pipeline_mode = #tpu.pipeline_mode<synchronous>, transform_indices = @transform_3, window_bounds = array<i64: 1, 32>}, {transform_indices = @transform_4, window_bounds = array<i64: 1, 8, 32>}]} {
    %c0_i32 = arith.constant 0 : i32
    %0 = arith.cmpi eq, %arg1, %c0_i32 : i32
    %1 = arith.extui %0 : i1 to i32
    %c0_i32_0 = arith.constant 0 : i32
    %2 = arith.cmpi ne, %1, %c0_i32_0 : i32
    scf.if %2 {
      %c0_52 = arith.constant 0 : index
      %c0_53 = arith.constant 0 : index
      %c0_54 = arith.constant 0 : index
      %114 = vector.load %arg2[%c0_52, %c0_53, %c0_54] : memref<1x8x32xf32, #tpu.memory_space<vmem>>, vector<1x8x32xf32>
      %115 = vector.shape_cast %114 : vector<1x8x32xf32> to vector<8x32xf32>
      %116 = arith.truncf %115 : vector<8x32xf32> to vector<8x32xbf16>
      %c0_55 = arith.constant 0 : index
      %c32_56 = arith.constant 32 : index
      %117 = vector.load %arg3[%c0_55, %c32_56] : memref<32x96xbf16, #tpu.memory_space<vmem>>, vector<32x64xbf16>
      %cst_57 = arith.constant dense<0.000000e+00> : vector<8x64xf32>
      %118 = tpu.matmul %116, %117, %cst_57 {dimension_numbers = #tpu.dot_dimension_numbers<[1], [0], [0], [1], [0, 0, 1, 1], [], []>} : vector<8x32xbf16>, vector<32x64xbf16>, vector<8x64xf32> -> vector<8x64xf32>
      %119 = arith.truncf %118 : vector<8x64xf32> to vector<8x64xbf16>
      %c0_58 = arith.constant 0 : index
      %c0_59 = arith.constant 0 : index
      %120 = vector.load %arg7[%c0_58, %c0_59] : memref<8x64xbf16, #tpu.memory_space<vmem>>, vector<8x64xbf16>
      tpu.vector_store %arg7[%c0_58, %c0_59], %119 {strides = array<i32>} : memref<8x64xbf16, #tpu.memory_space<vmem>>, vector<8x64xbf16>,
    } else {
    }
    %c8_i32 = arith.constant 8 : i32
    %3 = arith.muli %arg1, %c8_i32 : i32
    %4 = tpu.assume_multiple %3, 8 : i32
    %c0 = arith.constant 0 : index
    %5 = arith.index_cast %4 : i32 to index
    %c0_1 = arith.constant 0 : index
    %6 = vector.load %arg2[%c0, %5, %c0_1] : memref<1x8x32xf32, #tpu.memory_space<vmem>>, vector<1x8x32xf32>
    %7 = vector.shape_cast %6 : vector<1x8x32xf32> to vector<8x32xf32>
    %8 = arith.truncf %7 : vector<8x32xf32> to vector<8x32xbf16>
    %c0_2 = arith.constant 0 : index
    %c0_3 = arith.constant 0 : index
    %9 = vector.load %arg3[%c0_2, %c0_3] : memref<32x96xbf16, #tpu.memory_space<vmem>>, vector<32x32xbf16>
    %cst = arith.constant dense<0.000000e+00> : vector<8x32xf32>
    %10 = tpu.matmul %8, %9, %cst {dimension_numbers = #tpu.dot_dimension_numbers<[1], [0], [0], [1], [0, 0, 1, 1], [], []>} : vector<8x32xbf16>, vector<32x32xbf16>, vector<8x32xf32> -> vector<8x32xf32>
    %cst_4 = arith.constant 0.353553385 : f32
    %11 = vector.broadcast %cst_4 : f32 to vector<8x32xf32>
    %12 = arith.mulf %10, %11 : vector<8x32xf32>
    %13 = arith.truncf %12 : vector<8x32xf32> to vector<8x32xbf16>
    %14 = tpu.iota {dimensions = array<i32: 0>} : vector<8x8xi32>
    %15 = vector.broadcast %4 : i32 to vector<8x8xi32>
    %16 = arith.addi %15, %14 : vector<8x8xi32>
    %17 = tpu.iota {dimensions = array<i32: 1>} : vector<8x8xi32>
    %18 = arith.cmpi sle, %17, %16 : vector<8x8xi32>
    %cst_5 = arith.constant 0.000000e+00 : f32
    %19 = vector.broadcast %cst_5 : f32 to vector<8x32xf32>
    %c0_6 = arith.constant 0 : index
    %c0_7 = arith.constant 0 : index
    %20 = vector.load %arg5[%c0_6, %c0_7] : memref<1x32xf32, #tpu.memory_space<vmem>>, vector<1x32xf32>
    %21 = vector.broadcast %20 : vector<1x32xf32> to vector<8x32xf32>
    %22 = arith.addf %19, %21 : vector<8x32xf32>
    %23 = vector.extract_strided_slice %13 {offsets = [0, 0], sizes = [8, 8], strides = [1, 1]} : vector<8x32xbf16> to vector<8x8xbf16>
    %c0_8 = arith.constant 0 : index
    %c0_9 = arith.constant 0 : index
    %24 = vector.load %arg7[%c0_8, %c0_9] : memref<8x64xbf16, #tpu.memory_space<vmem>>, vector<8x8xbf16>
    %c0_10 = arith.constant 0 : index
    %c32 = arith.constant 32 : index
    %25 = vector.load %arg7[%c0_10, %c32] : memref<8x64xbf16, #tpu.memory_space<vmem>>, vector<8x8xbf16>
    %cst_11 = arith.constant dense<0.000000e+00> : vector<8x8xf32>
    %26 = tpu.matmul %23, %24, %cst_11 {dimension_numbers = #tpu.dot_dimension_numbers<[1], [1], [0], [0], [0, 0, 1, 0], [], []>} : vector<8x8xbf16>, vector<8x8xbf16>, vector<8x8xf32> -> vector<8x8xf32>
    %cst_12 = arith.constant 0xFF800000 : f32
    %27 = vector.broadcast %cst_12 : f32 to vector<8x8xf32>
    %28 = arith.select %18, %26, %27 : vector<8x8xi1>, vector<8x8xf32>
    %cst_13 = arith.constant dense<0xFF800000> : vector<8xf32>
    %29 = vector.multi_reduction <maximumf>, %28, %cst_13 [1] : vector<8x8xf32> to vector<8xf32>
    %30 = vector.shape_cast %29 : vector<8xf32> to vector<8x1xf32>
    %31 = vector.broadcast %30 : vector<8x1xf32> to vector<8x8xf32>
    %32 = arith.subf %28, %31 : vector<8x8xf32>
    %33 = math.exp %32 : vector<8x8xf32>
    %cst_14 = arith.constant dense<0.000000e+00> : vector<8xf32>
    %34 = vector.multi_reduction <add>, %33, %cst_14 [1] : vector<8x8xf32> to vector<8xf32>
    %35 = vector.shape_cast %34 : vector<8xf32> to vector<8x1xf32>
    %36 = arith.truncf %33 : vector<8x8xf32> to vector<8x8xbf16>
    %cst_15 = arith.constant dense<0.000000e+00> : vector<8x8xf32>
    %37 = tpu.matmul %36, %25, %cst_15 {dimension_numbers = #tpu.dot_dimension_numbers<[1], [0], [0], [1], [0, 0, 1, 1], [], []>} : vector<8x8xbf16>, vector<8x8xbf16>, vector<8x8xf32> -> vector<8x8xf32>
    %38 = tpu.reciprocal %35 {approx = true} : vector<8x1xf32> -> vector<8x1xf32>
    %39 = vector.broadcast %38 : vector<8x1xf32> to vector<8x8xf32>
    %40 = arith.mulf %37, %39 : vector<8x8xf32>
    %41 = arith.truncf %40 : vector<8x8xf32> to vector<8x8xbf16>
    %c0_16 = arith.constant 0 : index
    %c0_17 = arith.constant 0 : index
    %42 = vector.load %arg4[%c0_16, %c0_17] : memref<32x32xbf16, #tpu.memory_space<vmem>>, vector<8x32xbf16>
    %cst_18 = arith.constant dense<0.000000e+00> : vector<8x32xf32>
    %43 = tpu.matmul %41, %42, %cst_18 {dimension_numbers = #tpu.dot_dimension_numbers<[1], [0], [0], [1], [0, 0, 1, 1], [], []>} : vector<8x8xbf16>, vector<8x32xbf16>, vector<8x32xf32> -> vector<8x32xf32>
    %44 = arith.addf %22, %43 : vector<8x32xf32>
    %45 = vector.extract_strided_slice %13 {offsets = [0, 8], sizes = [8, 8], strides = [1, 1]} : vector<8x32xbf16> to vector<8x8xbf16>
    %c0_19 = arith.constant 0 : index
    %c8 = arith.constant 8 : index
    %46 = vector.load %arg7[%c0_19, %c8] : memref<8x64xbf16, #tpu.memory_space<vmem>>, vector<8x8xbf16>
    %c0_20 = arith.constant 0 : index
    %c40 = arith.constant 40 : index
    %47 = vector.load %arg7[%c0_20, %c40] : memref<8x64xbf16, #tpu.memory_space<vmem>>, vector<8x8xbf16>
    %cst_21 = arith.constant dense<0.000000e+00> : vector<8x8xf32>
    %48 = tpu.matmul %45, %46, %cst_21 {dimension_numbers = #tpu.dot_dimension_numbers<[1], [1], [0], [0], [0, 0, 1, 0], [], []>} : vector<8x8xbf16>, vector<8x8xbf16>, vector<8x8xf32> -> vector<8x8xf32>
    %cst_22 = arith.constant 0xFF800000 : f32
    %49 = vector.broadcast %cst_22 : f32 to vector<8x8xf32>
    %50 = arith.select %18, %48, %49 : vector<8x8xi1>, vector<8x8xf32>
    %cst_23 = arith.constant dense<0xFF800000> : vector<8xf32>
    %51 = vector.multi_reduction <maximumf>, %50, %cst_23 [1] : vector<8x8xf32> to vector<8xf32>
    %52 = vector.shape_cast %51 : vector<8xf32> to vector<8x1xf32>
    %53 = vector.broadcast %52 : vector<8x1xf32> to vector<8x8xf32>
    %54 = arith.subf %50, %53 : vector<8x8xf32>
    %55 = math.exp %54 : vector<8x8xf32>
    %cst_24 = arith.constant dense<0.000000e+00> : vector<8xf32>
    %56 = vector.multi_reduction <add>, %55, %cst_24 [1] : vector<8x8xf32> to vector<8xf32>
    %57 = vector.shape_cast %56 : vector<8xf32> to vector<8x1xf32>
    %58 = arith.truncf %55 : vector<8x8xf32> to vector<8x8xbf16>
    %cst_25 = arith.constant dense<0.000000e+00> : vector<8x8xf32>
    %59 = tpu.matmul %58, %47, %cst_25 {dimension_numbers = #tpu.dot_dimension_numbers<[1], [0], [0], [1], [0, 0, 1, 1], [], []>} : vector<8x8xbf16>, vector<8x8xbf16>, vector<8x8xf32> -> vector<8x8xf32>
    %60 = tpu.reciprocal %57 {approx = true} : vector<8x1xf32> -> vector<8x1xf32>
    %61 = vector.broadcast %60 : vector<8x1xf32> to vector<8x8xf32>
    %62 = arith.mulf %59, %61 : vector<8x8xf32>
    %63 = arith.truncf %62 : vector<8x8xf32> to vector<8x8xbf16>
    %c8_26 = arith.constant 8 : index
    %c0_27 = arith.constant 0 : index
    %64 = vector.load %arg4[%c8_26, %c0_27] : memref<32x32xbf16, #tpu.memory_space<vmem>>, vector<8x32xbf16>
    %cst_28 = arith.constant dense<0.000000e+00> : vector<8x32xf32>
    %65 = tpu.matmul %63, %64, %cst_28 {dimension_numbers = #tpu.dot_dimension_numbers<[1], [0], [0], [1], [0, 0, 1, 1], [], []>} : vector<8x8xbf16>, vector<8x32xbf16>, vector<8x32xf32> -> vector<8x32xf32>
    %66 = arith.addf %44, %65 : vector<8x32xf32>
    %67 = vector.extract_strided_slice %13 {offsets = [0, 16], sizes = [8, 8], strides = [1, 1]} : vector<8x32xbf16> to vector<8x8xbf16>
    %c0_29 = arith.constant 0 : index
    %c16 = arith.constant 16 : index
    %68 = vector.load %arg7[%c0_29, %c16] : memref<8x64xbf16, #tpu.memory_space<vmem>>, vector<8x8xbf16>
    %c0_30 = arith.constant 0 : index
    %c48 = arith.constant 48 : index
    %69 = vector.load %arg7[%c0_30, %c48] : memref<8x64xbf16, #tpu.memory_space<vmem>>, vector<8x8xbf16>
    %cst_31 = arith.constant dense<0.000000e+00> : vector<8x8xf32>
    %70 = tpu.matmul %67, %68, %cst_31 {dimension_numbers = #tpu.dot_dimension_numbers<[1], [1], [0], [0], [0, 0, 1, 0], [], []>} : vector<8x8xbf16>, vector<8x8xbf16>, vector<8x8xf32> -> vector<8x8xf32>
    %cst_32 = arith.constant 0xFF800000 : f32
    %71 = vector.broadcast %cst_32 : f32 to vector<8x8xf32>
    %72 = arith.select %18, %70, %71 : vector<8x8xi1>, vector<8x8xf32>
    %cst_33 = arith.constant dense<0xFF800000> : vector<8xf32>
    %73 = vector.multi_reduction <maximumf>, %72, %cst_33 [1] : vector<8x8xf32> to vector<8xf32>
    %74 = vector.shape_cast %73 : vector<8xf32> to vector<8x1xf32>
    %75 = vector.broadcast %74 : vector<8x1xf32> to vector<8x8xf32>
    %76 = arith.subf %72, %75 : vector<8x8xf32>
    %77 = math.exp %76 : vector<8x8xf32>
    %cst_34 = arith.constant dense<0.000000e+00> : vector<8xf32>
    %78 = vector.multi_reduction <add>, %77, %cst_34 [1] : vector<8x8xf32> to vector<8xf32>
    %79 = vector.shape_cast %78 : vector<8xf32> to vector<8x1xf32>
    %80 = arith.truncf %77 : vector<8x8xf32> to vector<8x8xbf16>
    %cst_35 = arith.constant dense<0.000000e+00> : vector<8x8xf32>
    %81 = tpu.matmul %80, %69, %cst_35 {dimension_numbers = #tpu.dot_dimension_numbers<[1], [0], [0], [1], [0, 0, 1, 1], [], []>} : vector<8x8xbf16>, vector<8x8xbf16>, vector<8x8xf32> -> vector<8x8xf32>
    %82 = tpu.reciprocal %79 {approx = true} : vector<8x1xf32> -> vector<8x1xf32>
    %83 = vector.broadcast %82 : vector<8x1xf32> to vector<8x8xf32>
    %84 = arith.mulf %81, %83 : vector<8x8xf32>
    %85 = arith.truncf %84 : vector<8x8xf32> to vector<8x8xbf16>
    %c16_36 = arith.constant 16 : index
    %c0_37 = arith.constant 0 : index
    %86 = vector.load %arg4[%c16_36, %c0_37] : memref<32x32xbf16, #tpu.memory_space<vmem>>, vector<8x32xbf16>
    %cst_38 = arith.constant dense<0.000000e+00> : vector<8x32xf32>
    %87 = tpu.matmul %85, %86, %cst_38 {dimension_numbers = #tpu.dot_dimension_numbers<[1], [0], [0], [1], [0, 0, 1, 1], [], []>} : vector<8x8xbf16>, vector<8x32xbf16>, vector<8x32xf32> -> vector<8x32xf32>
    %88 = arith.addf %66, %87 : vector<8x32xf32>
    %89 = vector.extract_strided_slice %13 {offsets = [0, 24], sizes = [8, 8], strides = [1, 1]} : vector<8x32xbf16> to vector<8x8xbf16>
    %c0_39 = arith.constant 0 : index
    %c24 = arith.constant 24 : index
    %90 = vector.load %arg7[%c0_39, %c24] : memref<8x64xbf16, #tpu.memory_space<vmem>>, vector<8x8xbf16>
    %c0_40 = arith.constant 0 : index
    %c56 = arith.constant 56 : index
    %91 = vector.load %arg7[%c0_40, %c56] : memref<8x64xbf16, #tpu.memory_space<vmem>>, vector<8x8xbf16>
    %cst_41 = arith.constant dense<0.000000e+00> : vector<8x8xf32>
    %92 = tpu.matmul %89, %90, %cst_41 {dimension_numbers = #tpu.dot_dimension_numbers<[1], [1], [0], [0], [0, 0, 1, 0], [], []>} : vector<8x8xbf16>, vector<8x8xbf16>, vector<8x8xf32> -> vector<8x8xf32>
    %cst_42 = arith.constant 0xFF800000 : f32
    %93 = vector.broadcast %cst_42 : f32 to vector<8x8xf32>
    %94 = arith.select %18, %92, %93 : vector<8x8xi1>, vector<8x8xf32>
    %cst_43 = arith.constant dense<0xFF800000> : vector<8xf32>
    %95 = vector.multi_reduction <maximumf>, %94, %cst_43 [1] : vector<8x8xf32> to vector<8xf32>
    %96 = vector.shape_cast %95 : vector<8xf32> to vector<8x1xf32>
    %97 = vector.broadcast %96 : vector<8x1xf32> to vector<8x8xf32>
    %98 = arith.subf %94, %97 : vector<8x8xf32>
    %99 = math.exp %98 : vector<8x8xf32>
    %cst_44 = arith.constant dense<0.000000e+00> : vector<8xf32>
    %100 = vector.multi_reduction <add>, %99, %cst_44 [1] : vector<8x8xf32> to vector<8xf32>
    %101 = vector.shape_cast %100 : vector<8xf32> to vector<8x1xf32>
    %102 = arith.truncf %99 : vector<8x8xf32> to vector<8x8xbf16>
    %cst_45 = arith.constant dense<0.000000e+00> : vector<8x8xf32>
    %103 = tpu.matmul %102, %91, %cst_45 {dimension_numbers = #tpu.dot_dimension_numbers<[1], [0], [0], [1], [0, 0, 1, 1], [], []>} : vector<8x8xbf16>, vector<8x8xbf16>, vector<8x8xf32> -> vector<8x8xf32>
    %104 = tpu.reciprocal %101 {approx = true} : vector<8x1xf32> -> vector<8x1xf32>
    %105 = vector.broadcast %104 : vector<8x1xf32> to vector<8x8xf32>
    %106 = arith.mulf %103, %105 : vector<8x8xf32>
    %107 = arith.truncf %106 : vector<8x8xf32> to vector<8x8xbf16>
    %c24_46 = arith.constant 24 : index
    %c0_47 = arith.constant 0 : index
    %108 = vector.load %arg4[%c24_46, %c0_47] : memref<32x32xbf16, #tpu.memory_space<vmem>>, vector<8x32xbf16>
    %cst_48 = arith.constant dense<0.000000e+00> : vector<8x32xf32>
    %109 = tpu.matmul %107, %108, %cst_48 {dimension_numbers = #tpu.dot_dimension_numbers<[1], [0], [0], [1], [0, 0, 1, 1], [], []>} : vector<8x8xbf16>, vector<8x32xbf16>, vector<8x32xf32> -> vector<8x32xf32>
    %110 = arith.addf %88, %109 : vector<8x32xf32>
    %c0_49 = arith.constant 0 : index
    %c0_50 = arith.constant 0 : index
    %c0_51 = arith.constant 0 : index
    %111 = vector.load %arg6[%c0_49, %c0_50, %c0_51] : memref<1x8x32xf32, #tpu.memory_space<vmem>>, vector<1x8x32xf32>
    %112 = vector.shape_cast %111 : vector<1x8x32xf32> to vector<8x32xf32>
    %113 = vector.shape_cast %110 : vector<8x32xf32> to vector<1x8x32xf32>
    tpu.vector_store %arg6[%c0_49, %c0_50, %c0_51], %113 {strides = array<i32>} : memref<1x8x32xf32, #tpu.memory_space<vmem>>, vector<1x8x32xf32>,
    return
  }
  func.func @transform_0(%arg0: i32, %arg1: i32) -> (i32, i32, i32) {
    %c0_i32 = arith.constant 0 : i32
    %c0_i32_0 = arith.constant 0 : i32
    %c0_i32_1 = arith.constant 0 : i32
    return %arg0, %c0_i32, %c0_i32_0 : i32, i32, i32
  }
  func.func @transform_1(%arg0: i32, %arg1: i32) -> (i32, i32) {
    %c0_i32 = arith.constant 0 : i32
    %c0_i32_0 = arith.constant 0 : i32
    %c0_i32_1 = arith.constant 0 : i32
    return %c0_i32, %c0_i32_0 : i32, i32
  }
  func.func @transform_2(%arg0: i32, %arg1: i32) -> (i32, i32) {
    %c0_i32 = arith.constant 0 : i32
    %c0_i32_0 = arith.constant 0 : i32
    %c0_i32_1 = arith.constant 0 : i32
    return %c0_i32, %c0_i32_0 : i32, i32
  }
  func.func @transform_3(%arg0: i32, %arg1: i32) -> (i32, i32) {
    %c0_i32 = arith.constant 0 : i32
    %c0_i32_0 = arith.constant 0 : i32
    %c0_i32_1 = arith.constant 0 : i32
    return %c0_i32, %c0_i32_0 : i32, i32
  }
  func.func @transform_4(%arg0: i32, %arg1: i32) -> (i32, i32, i32) {
    %c0_i32 = arith.constant 0 : i32
    %c0_i32_0 = arith.constant 0 : i32
    return %arg0, %arg1, %c0_i32 : i32, i32, i32
  }
}

</mosaic_0001>

<bundles_post_ra>
// kernel: tpu_custom_call.1
= control target key start
LH: loop header
LB: loop body
LE: loop exit
PB: predicated region body
PF: predicated region fallthrough
CT: control target
= control target key end

     0   :  { %9 = vsyncpa [#allocation4], 0  ;;  %s1956_s0 = inlined_call_operand.hbm [shape: f32[2,8,32], index: 0, kind: input, shape index: {}]   ;;  %s1957_s1 = inlined_call_operand.hbm [shape: bf16[32,96], index: 1, kind: input, shape index: {}]   ;;  %s1958_s2 = inlined_call_operand.hbm [shape: bf16[32,32], index: 2, kind: input, shape index: {}]   ;;  %s1959_s3 = inlined_call_operand.vmem [shape: f32[1,32], index: 3, kind: input, shape index: {}]   ;;  %s1960_s4 = inlined_call_operand.hbm [shape: f32[2,8,32], index: 4, kind: output, shape index: {}]  }
   0x1   :  { %11 = vsyncpa [#allocation4 + $0x1], 0 }
   0x2   :  { %12 = vsyncpa [#allocation7], 0 }
   0x3   :  { %13 = vsyncpa [#allocation5], 0 }
   0x4   :  { %15 = vsyncpa [#allocation5 + $0x1], 0  ;;  %s1646_s15 = smov 0   ;;  %s1648_s16 = smov 0  }
   0x5   :  { %s1650_s17 = smov 0   ;;  %s1652_s18 = smov 0  }
   0x6   :  { %s1654_s19 = smov 0   ;;  %s1656_s20 = smov 0  }
   0x7 LB: > { %s1170_s21 = sadd.s32 4294967295, %s1604_s20   ;;  %s1171_s22 = sadd.s32 4294967294, %s1604_s20   ;;  %s1604_s20 = sphi %s1656_s20, %s21_s20   ;;  %s1600_s19 = sphi %s1654_s19, %s1980_s19   ;;  %s1596_s18 = sphi %s1652_s18, %s1979_s18   ;;  %s1592_s17 = sphi %s1650_s17, %s1978_s17   ;;  %s1588_s16 = sphi %s1648_s16, %s1977_s16   ;;  %s1584_s15 = sphi %s1646_s15, %s1976_s15  }
   0x8   : > { %p53_p0 = scmp.ne.s32.totalorder %s1588_s16, %s1584_s15  ;;  %p1680_p1 = scmp.eq.s32.totalorder %s1170_s21, 0 }
   0x9   : > { %p1684_p2 = scmp.eq.s32.totalorder %s1170_s21, 1  ;;  %p148_p3 = scmp.eq.s32.totalorder %s1171_s22, 1 }
   0xa   : > { %s1964_s23 = scalar_select %p1680_p1, 1, 0 }
   0xb   : > { %p1690_p4 = por %p1680_p1, %p53_p0  ;;  %p1172_p5 = scmp.ge.s32.totalorder %s1604_s20, 1 }
   0xc   : > { %p1695_p6 = por %p148_p3, %p53_p0  ;;  %p155_p7 = scmp.lt.s32.totalorder %s1604_s20, 3 }
   0xd   : > { %s1966_s25 = scalar_select %p1690_p4, 1, 0 }
   0xe   : > { %s1967_s26 = scalar_select %p1695_p6, 1, 0 }
   0xf   : > { %p1700_p8 = pnand %p1172_p5, %p155_p7  ;;  %s1606_s28 = smov [#allocation6]  }
  0x10   : > { %s167_s29 = sshll.u32 %s1606_s28, 4  ;;  %s1607_s5 = smov [#allocation8]   ;;  %s168_s29 = int_to_ptr.vmem [resolvable:$true] %s167_s29 }
  0x11   : > { %p1337_p9 = pneg %p1700_p8  ;;  %s180_s6 = sshll.u32 %s1607_s5, 4  ;;  %s181_s6 = int_to_ptr.vmem [resolvable:$true] %s180_s6 }
  0x12   : > { %s1451_s7 = scalar_lea.vmem %s168_s29, 256  ;;  %p1459_p5 = scmp.lt.s32.totalorder %s168_s29, %s168_s29 }
  0x13   : > { %p1709_p11 = pnand %p1337_p9, %p1680_p1  ;;  %p1452_p13 = scmp.ne.s32.totalorder %s168_s29, %s1451_s7 }
  0x14   : > { %p1460_p7 = scmp.lt.s32.totalorder %s1451_s7, %s1451_s7 }
  0x15   : > { %p1442_p12 = pneg %p1709_p11 }
  0x16   : > { %p1461_p10 = por %p1460_p7, %p1459_p5 }
  0x17   : > { %p1454_p0 = pnand %p1452_p13, %p1442_p12 }
  0x19   : > { %p1455_p3 = pneg %p1454_p0 }
  0x1b   : > { %p1462_p9 = pnand %p1461_p10, %p1455_p3 }
  0x1d   : > { %1465 = shalt.err (!%p1462_p9)
}
  0x1e   : > { %s1608_s8 = smov 64   ;;  %s1609_s9 = smov 4  }
  0x1f   : > { %1340 = dma.hbm_to_vmem [thread:$0]  (!%p1709_p11), %s1957_s1, 256, %s168_s29, [#allocation7], %s1608_s8, %s1608_s8, %s1609_s9  }
  0x20   : > { %s1477_s12 = scalar_lea.vmem %s181_s6, 256  ;;  %p1485_p1 = scmp.lt.s32.totalorder %s181_s6, %s181_s6 }
  0x21   : > { %p1478_p6 = scmp.ne.s32.totalorder %s181_s6, %s1477_s12  ;;  %p1486_p4 = scmp.lt.s32.totalorder %s1477_s12, %s1477_s12 }
  0x23   : > { %p1480_p13 = pnand %p1478_p6, %p1442_p12  ;;  %p1487_p5 = por %p1486_p4, %p1485_p1 }
  0x25   : > { %p1481_p0 = pneg %p1480_p13 }
  0x27   : > { %p1488_p10 = pnand %p1487_p5, %p1481_p0 }
  0x29   : > { %1491 = shalt.err (!%p1488_p10)
}
  0x2a   : > { %1343 = dma.hbm_to_vmem [thread:$0]  (!%p1709_p11), %s1958_s2, 256, %s181_s6, [#allocation7], %s1608_s8, %s1608_s8, %s1609_s9  }
  0x2b   : > { %s33_s21 = sadd.s32 1, %s1600_s19  ;;  %s40_s22 = sadd.s32 1, %s1592_s17 }
  0x2c   : > { %p35_p1 = scmp.ge.s32.totalorder %s33_s21, 2  ;;  %p47_p4 = scmp.ne.s32.totalorder %s1592_s17, %s1588_s16 }
  0x2d   : > { %p48_p6 = scmp.eq.s32.totalorder %s1604_s20, 0  ;;  %p1354_p12 = scmp.lt.s32.totalorder %s1604_s20, 2 }
  0x2e   : > { %s1982_s21 = smov (%p35_p1, %s33_s21), 0  ;;  %p1741_p7 = por %p1684_p2, %p47_p4 }
  0x2f   : > { %p49_p3 = por %p48_p6, %p47_p4  ;;  %s37_s29 = ssub.s32 %s1600_s19, %s1982_s21 }
  0x30   : > { %s197_s30 = sand.u32 1, %s1592_s17   ;;  %p38_p9 = scmp.eq.s32.totalorder %s37_s29, 0 }
  0x31   : > { %s1176_s5 = sshll.u32 %s197_s30, 3  ;;  %s1177_s6 = sshll.u32 %s1600_s19, 7 }
  0x32   : > { %s1750_s7 = scalar_select %p38_p9, %s1592_s17, %s40_s22  }
  0x33   : > { %s206_s10 = scalar_lea.hbm %s1956_s0, %s1177_s6  ;;  %s201_s11 = scalar_lea.vmem [#allocation3], %s1176_s5 }
  0x34   : > { %s208_s12 = sshll.u32 %s201_s11, 4  ;;  %p1757_p11 = pnand %p1354_p12, %p49_p3  ;;  %s209_s12 = int_to_ptr.vmem [resolvable:$true] %s208_s12 }
  0x35   : > { %s198_s13 = scalar_lea.sflag [#allocation4], %s197_s30  ;;  %s1505_s14 = scalar_lea.vmem %s209_s12, 128 }
  0x36   : > { %p1494_p2 = pneg %p1757_p11  ;;  %p1506_p13 = scmp.ne.s32.totalorder %s209_s12, %s1505_s14 }
  0x37   : > { %s1610_s22 = smov [#allocation3]  }
  0x38   : > { %p1508_p0 = pnand %p1506_p13, %p1494_p2  ;;  %s1510_s29 = sshll.u32 %s1610_s22, 4  ;;  %s1511_s29 = int_to_ptr.vmem [resolvable:$false] %s1510_s29 }
  0x39   : > { %s1512_s6 = scalar_lea.vmem %s1511_s29, 256  ;;  %p1513_p10 = scmp.lt.s32.totalorder %s209_s12, %s1511_s29 }
  0x3a   : > { %p1509_p5 = pneg %p1508_p0  ;;  %p1514_p1 = scmp.lt.s32.totalorder %s1512_s6, %s1505_s14 }
  0x3c   : > { %p1515_p4 = por %p1514_p1, %p1513_p10 }
  0x3e   : > { %p1516_p6 = pnand %p1515_p4, %p1509_p5 }
  0x40   : > { %1519 = shalt.err (!%p1516_p6)
}
  0x41   : > { %1347 = dma.hbm_to_vmem [thread:$0]  (!%p1757_p11), %s206_s10, 128, %s209_s12, %s198_s13  }
  0x42   : > { %217 = sbr.rel (%p1700_p8) target bundleno = 2253 (0x8cd), region = 36  ;;  %s1768_s30 = sand.u32 (!%p1700_p8), 1, %s1588_s16  }
  0x43   : > { %s1179_s5 = sshll.u32 (!%p1700_p8), %s1768_s30, 3  ;;  %s220_s8 = scalar_lea.sflag (!%p1700_p8), [#allocation4], %s1768_s30 }
  0x44   : > { %s223_s9 = scalar_lea.vmem (!%p1700_p8), [#allocation3], %s1179_s5  ;;  %p1972_p12 = scmp.ne.s32.totalorder (!%p1700_p8), %s1966_s25, 0 }
  0x47   : > { %1571 = dma.done.wait (%p1972_p12), %s220_s8, 128  }
  0x48   : > { %1573 = vsyncadd (%p1972_p12), %s220_s8, 4294967168  ;;  %p1973_p3 = scmp.ne.s32.totalorder %s1964_s23, 0 }
  0x4a   : > { %1575 = dma.done.wait (%p1973_p3), [#allocation7], 512  }
  0x4b   : > { %1577 = vsyncadd (%p1973_p3), [#allocation7], 4294966784  ;;  %v1611_v0 = vmov 0.0   ;;  %vm1612_vm0 = vmmov 0   ;;  %v1419_v1 = vld [vmem:[#allocation6 + $0x8] sm:$0xff]   ;;  %s1613_s25 = smov 96   ;;  %v396_v23 = vlaneseq }
  0x4c   : > { %1237 = vmatprep.subr.bf16.mxu0 %v1611_v0  ;;  %1241 = vmatprep.mubr.msk.bf16.mxu0 %vm1612_vm0, %v1611_v0  ;;  %v1420_v2 = vld [vmem:[#allocation6] sm:$0xff]   ;;  %v1421_v3 = vld [vmem:[#allocation6 + $0x8] sm:$0xff]   ;;  %v261_v5 = vld [vmem:[%s223_s9] sm:$0xff]  ;;  %vm283_vm1 = vcmask 261120   ;;  %vm328_vm2 = vcmask 519168   ;;  %vm412_vm3 = vcmask 64512  }
  0x4d   : > { %1245 = vmatprep.subr.bf16.mxu1 %v1611_v0  ;;  %1249 = vmatprep.mubr.msk.bf16.mxu1 %vm1612_vm0, %v1611_v0  ;;  %v1422_v4 = vld [vmem:[#allocation6] sm:$0xff]   ;;  %v262_v6 = vpack.c.bf16 %v261_v5, %v261_v5  ;;  %s1614_s23 = smov 120   ;;  %v1812_v24 = vshrl.u32 %v396_v23, 7  ;;  %v1814_v25 = vand.u32 127, %v396_v23  ;;  %vm478_vm5 = vcmask 1043456   ;;  %s1615_s27 = smov 88  }
  0x4e   : > { %279 = vrot.lane.b32.xlu0 %v1419_v1, %s1613_s25  ;;  %1246 = vmatpush3.bf16.msra.mxu1 %v1421_v3  ;;  %s1616_s10 = smov 112   ;;  %v525_v43 = vld [vmem:[#allocation8] sm:$0xf]  ;;  %s1617_s11 = smov 80  }
  0x4f   : > { %1247 = vmatprep.subr.bf16.mxu1 %v1611_v0  ;;  %vm402_vm4 = vcmp.le.s32.totalorder %v1814_v25, %v1812_v24  ;;  %v530_v44 = vsel %vm478_vm5, %v525_v43, 0  ;;  %s1618_s12 = smov 104   ;;  %s1619_s14 = smov 72  }
  0x50   : > { %s1204_s22 = sshll.u32 %s1596_s18, 7  ;;  %s255_s29 = scalar_lea.vmem [#allocation9], %s1179_s5 }
  0x51   : > { %s1070_s6 = sshll.u32 %s255_s29, 4  ;;  %s1056_s18 = scalar_lea.sflag [#allocation5], %s1768_s30  ;;  %s1909_s6 = int_to_ptr.vmem [resolvable:$true] %s1070_s6 }
  0x52   : > { %277 = vrot.lane.b32.xlu0 %v1420_v2, %s1613_s25  ;;  %1248 = vmatpush3.bf16.msra.mxu1 %v1422_v4  ;;  %s1620_s5 = smov [#allocation9]  }
  0x53   : > { %1259 = vmatprep.subr.bf16.mxu1 %v1611_v0 }
  0x55   : > { %1250 = vmatmul.mubr.msk.bf16.vlgmr.msra.gmra.mxu1 %vm283_vm1, %v262_v6 }
  0x56   : > { %1261 = vmatprep.mubr.msk.bf16.mxu1 %vm1612_vm0, %v1611_v0 }
  0xc0   : > { %v280_v7 = vpop.permute.xlu0 %279 }
  0xc1   : > { %1238 = vmatpush3.bf16.msra.mxu0 %v280_v7 }
  0xc2   : > { %1239 = vmatprep.subr.bf16.mxu0 %v1611_v0 }
  0xc4   : > { %v278_v8 = vpop.permute.xlu0 %277 }
  0xc5   : > { %1240 = vmatpush3.bf16.msra.mxu0 %v278_v8 }
  0xc6   : > { %1253 = vmatprep.subr.bf16.mxu0 %v1611_v0 }
  0xc8   : > { %1242 = vmatmul.mubr.msk.bf16.vlgmr.msra.gmra.mxu0 %vm283_vm1, %v262_v6 }
  0xc9   : > { %1255 = vmatprep.mubr.msk.bf16.mxu0 %vm1612_vm0, %v1611_v0 }
 0x115   : > { %v388_v9 = vpop.f32.mrf.mxu1 }
 0x116   : > { %v394_v18 = vmul.f32 0.35355338, %v388_v9 }
 0x117   : > { %v1251_v10 = vpop.f32.mrf.mxu1 }
 0x118   : > { %v1803_v22 = vpack.c.bf16 %v394_v18, %v394_v18 }
 0x119   : > { %v391_v11 = vpop.f32.mrf.mxu1 }
 0x11a   : > { %v686_v11 = vld [vmem:[#allocation8 + $0x4] sm:$0xf] }
 0x11b   : > { %v1252_v12 = vpop.f32.mrf.mxu1 }
 0x11c   : > { %v691_v12 = vsel %vm478_vm5, %v686_v11, 0 }
 0x188   : > { %v321_v13 = vpop.f32.mrf.mxu0 }
 0x189   : > { %v327_v14 = vpack.c.bf16 %v321_v13, %v321_v13 }
 0x18a   : > { %v1243_v15 = vpop.f32.mrf.mxu0 }
 0x18b   : > { %329 = vst.msk [vmem:[#allocation2] sm:$0xf] %vm328_vm2, %v327_v14 }
 0x18c   : > { %v324_v16 = vpop.f32.mrf.mxu0 }
 0x18e   : > { %v1244_v17 = vpop.f32.mrf.mxu0 }
 0x192   : > { %v411_v19 = vld [vmem:[#allocation2] sm:$0xf] }
 0x193   : > { %v417_v20 = vsel %vm412_vm3, %v411_v19, 0  ;;  %v1801_v21 = vcombine.low %v411_v19, %v411_v19 }
 0x194   : > { %1254 = vmatpush3.bf16.xpose.msra.mxu0 %v417_v20 }
 0x195   : > { %576 = vrot.lane.b32.xlu0 %v1801_v21, %s1614_s23  ;;  %1265 = vmatprep.subr.bf16.mxu0 %v1611_v0 }
 0x199   : > { %574 = vrot.lane.b32.xlu0 %v1803_v22, %s1614_s23  ;;  %s1520_s23 = scalar_lea.vmem %s1909_s6, 128 }
 0x19a   : > { %p1521_p8 = scmp.ne.s32.totalorder %s1909_s6, %s1520_s23 }
 0x19b   : > { %1256 = vmatmul.mubr.msk.bf16.vlgmr.msra.gmra.mxu0 %vm412_vm3, %v1803_v22 }
 0x19c   : > { %1267 = vmatprep.mubr.msk.bf16.mxu0 %vm1612_vm0, %v1611_v0  ;;  %1266 = vmatpush3.bf16.msra.mxu0 %v530_v44  ;;  %p1522_p9 = pnand %p1521_p8, %p1741_p7 }
 0x19d   : > { %1277 = vmatprep.subr.bf16.mxu0 %v1611_v0 }
 0x19e   : > { %p1523_p11 = pneg %p1522_p9 }
 0x207   : > { %v577_v38 = vpop.permute.xlu0 %576 }
 0x208   : > { %v582_v41 = vsel %vm412_vm3, %v577_v38, 0 }
 0x20b   : > { %v575_v42 = vpop.permute.xlu0 %574 }
 0x25b   : > { %v453_v26 = vpop.f32.mrf.mxu0 }
 0x25c   : > { %v459_v27 = vsel %vm402_vm4, %v453_v26, -inf }
 0x25d   : > { %v1257_v28 = vpop.f32.mrf.mxu0  ;;  %v460_v29 = vsel %vm412_vm3, %v459_v27, -inf }
 0x25e   : > { %461 = vmax.xlane.f32.xlu1 %v460_v29 }
 0x25f   : > { %v456_v30 = vpop.f32.mrf.mxu0 }
 0x261   : > { %v1258_v31 = vpop.f32.mrf.mxu0 }
 0x26f   : > { %473 = vrot.lane.b32.xlu1 %v1801_v21, %s1613_s25  ;;  %s1907_s25 = scalar_lea.hbm %s1960_s4, %s1204_s22 }
 0x2e7   : > { %v462_v32 = vpop.xlane.xlu1 %461 }
 0x2e8   : > { %v463_v33 = vsub.f32 %v459_v27, %v462_v32 }
 0x2ea   : > { %v464_v34 = vmul.f32 1.442695, %v463_v33 }
 0x2eb   : > { %v474_v35 = vpop.permute.xlu1 %473 }
 0x2ec   : > { %1424 = vpow2.f32 %v464_v34  ;;  %v480_v36 = vsel %vm478_vm5, %v474_v35, 0 }
 0x2ed   : > { %1260 = vmatpush3.bf16.msra.mxu1 %v480_v36 }
 0x2ee   : > { %1271 = vmatprep.subr.bf16.mxu1 %v1611_v0 }
 0x2f9   : > { %v1425_v37 = vpop.eup %1424 }
 0x2fa   : > { %v466_v39 = vsel %vm412_vm3, %v1425_v37, 0.0  ;;  %v469_v40 = vpack.c.bf16 %v1425_v37, %v1425_v37 }
 0x2fb   : > { %467 = vadd.xlane.f32.xlu0 %v466_v39 }
 0x2fc   : > { %1262 = vmatmul.mubr.msk.bf16.vlgmr.msra.gmra.mxu1 %vm412_vm3, %v469_v40 }
 0x2fd   : > { %1272 = vmatpush3.bf16.xpose.msra.mxu1 %v582_v41  ;;  %1273 = vmatprep.mubr.msk.bf16.mxu1 %vm1612_vm0, %v1611_v0  ;;  %v1189_v41 = vld [vmem:[%s1959_s3] ss:$0 sm:$0xff] }
 0x2fe   : > { %1283 = vmatprep.subr.bf16.mxu1 %v1611_v0 }
 0x304   : > { %1274 = vmatmul.mubr.msk.bf16.vlgmr.msra.gmra.mxu1 %vm412_vm3, %v575_v42 }
 0x305   : > { %1285 = vmatprep.mubr.msk.bf16.mxu1 %vm1612_vm0, %v1611_v0  ;;  %1284 = vmatpush3.bf16.msra.mxu1 %v691_v12 }
 0x306   : > { %1295 = vmatprep.subr.bf16.mxu1 %v1611_v0 }
 0x311   : > { %635 = vrot.lane.b32.xlu0 %v1801_v21, %s1615_s27  ;;  %s1524_s27 = sshll.u32 %s1620_s5, 4  ;;  %s1525_s27 = int_to_ptr.vmem [resolvable:$false] %s1524_s27 }
 0x312   : > { %p1527_p2 = scmp.lt.s32.totalorder %s1909_s6, %s1525_s27 }
 0x315   : > { %734 = vrot.lane.b32.xlu0 %v1803_v22, %s1616_s10 }
 0x384   : > { %v468_v45 = vpop.xlane.xlu0 %467 }
 0x385   : > { %1426 = vrcp.f32 %v468_v45 }
 0x388   : > { %v636_v49 = vpop.permute.xlu0 %635 }
 0x389   : > { %v641_v53 = vsel %vm478_vm5, %v636_v49, 0 }
 0x38c   : > { %v735_v6 = vpop.permute.xlu0 %734 }
 0x392   : > { %v1427_v46 = vpop.eup %1426 }
 0x3bc   : > { %v516_v47 = vpop.f32.mrf.mxu1 }
 0x3bd   : > { %v523_v48 = vmul.f32 %v1427_v46, %v516_v47 }
 0x3be   : > { %v1263_v50 = vpop.f32.mrf.mxu1 }
 0x3bf   : > { %v524_v51 = vpack.c.bf16 %v523_v48, %v523_v48  ;;  %v846_v48 = vld [vmem:[#allocation8 + $0x8] sm:$0xf] }
 0x3c0   : > { %v519_v52 = vpop.f32.mrf.mxu1  ;;  %v851_v49 = vsel %vm478_vm5, %v846_v48, 0 }
 0x3c1   : > { %1268 = vmatmul.mubr.msk.bf16.vlgmr.msra.gmra.mxu0 %vm412_vm3, %v524_v51 }
 0x3c2   : > { %1278 = vmatpush3.bf16.msra.mxu0 %v641_v53  ;;  %v1264_v54 = vpop.f32.mrf.mxu1  ;;  %1279 = vmatprep.mubr.msk.bf16.mxu0 %vm1612_vm0, %v1611_v0 }
 0x3c3   : > { %1289 = vmatprep.subr.bf16.mxu0 %v1611_v0 }
 0x3c4   : > { %v618_v55 = vpop.f32.mrf.mxu1 }
 0x3c5   : > { %v624_v56 = vsel %vm402_vm4, %v618_v55, -inf }
 0x3c6   : > { %v1275_v57 = vpop.f32.mrf.mxu1  ;;  %v625_v58 = vsel %vm412_vm3, %v624_v56, -inf }
 0x3c7   : > { %626 = vmax.xlane.f32.xlu1 %v625_v58 }
 0x3c8   : > { %v621_v59 = vpop.f32.mrf.mxu1 }
 0x3ca   : > { %v1276_v60 = vpop.f32.mrf.mxu1 }
 0x3d8   : > { %736 = vrot.lane.b32.xlu1 %v1801_v21, %s1616_s10  ;;  %s1526_s10 = scalar_lea.vmem %s1525_s27, 256 }
 0x3d9   : > { %p1528_p13 = scmp.lt.s32.totalorder %s1526_s10, %s1520_s23 }
 0x3db   : > { %p1529_p0 = por %p1528_p13, %p1527_p2 }
 0x3dd   : > { %p1530_p5 = pnand %p1529_p0, %p1523_p11 }
 0x450   : > { %v627_v61 = vpop.xlane.xlu1 %626 }
 0x451   : > { %v628_v62 = vsub.f32 %v624_v56, %v627_v61 }
 0x453   : > { %v629_v63 = vmul.f32 1.442695, %v628_v62 }
 0x454   : > { %v737_v2 = vpop.permute.xlu1 %736 }
 0x455   : > { %1428 = vpow2.f32 %v629_v63  ;;  %v742_v5 = vsel %vm412_vm3, %v737_v2, 0 }
 0x462   : > { %v1429_v1 = vpop.eup %1428 }
 0x463   : > { %v631_v3 = vsel %vm412_vm3, %v1429_v1, 0.0  ;;  %v634_v4 = vpack.c.bf16 %v1429_v1, %v1429_v1 }
 0x464   : > { %632 = vadd.xlane.f32.xlu0 %v631_v3 }
 0x465   : > { %1280 = vmatmul.mubr.msk.bf16.vlgmr.msra.gmra.mxu0 %vm412_vm3, %v634_v4 }
 0x466   : > { %1290 = vmatpush3.bf16.xpose.msra.mxu0 %v742_v5  ;;  %1291 = vmatprep.mubr.msk.bf16.mxu0 %vm1612_vm0, %v1611_v0 }
 0x467   : > { %1301 = vmatprep.subr.bf16.mxu0 %v1611_v0 }
 0x46d   : > { %1292 = vmatmul.mubr.msk.bf16.vlgmr.msra.gmra.mxu0 %vm412_vm3, %v735_v6  ;;  %v1006_v6 = vld [vmem:[#allocation8 + $0xc] sm:$0xf] }
 0x46e   : > { %1303 = vmatprep.mubr.msk.bf16.mxu0 %vm1612_vm0, %v1611_v0  ;;  %1302 = vmatpush3.bf16.msra.mxu0 %v851_v49 }
 0x46f   : > { %1313 = vmatprep.subr.bf16.mxu0 %v1611_v0 }
 0x47a   : > { %795 = vrot.lane.b32.xlu0 %v1801_v21, %s1617_s11 }
 0x47e   : > { %894 = vrot.lane.b32.xlu0 %v1803_v22, %s1618_s12 }
 0x481   : > { %v566_v7 = vpop.f32.mrf.mxu0 }
 0x482   : > { %v572_v42 = vadd.f32 %v1189_v41, %v566_v7  ;;  %v1011_v7 = vsel %vm478_vm5, %v1006_v6, 0 }
 0x483   : > { %v1269_v8 = vpop.f32.mrf.mxu0 }
 0x485   : > { %v569_v9 = vpop.f32.mrf.mxu0 }
 0x487   : > { %v1270_v10 = vpop.f32.mrf.mxu0 }
 0x4ed   : > { %v633_v13 = vpop.xlane.xlu0 %632 }
 0x4ee   : > { %1430 = vrcp.f32 %v633_v13 }
 0x4f1   : > { %v796_v17 = vpop.permute.xlu0 %795 }
 0x4f2   : > { %v801_v22 = vsel %vm478_vm5, %v796_v17, 0 }
 0x4f5   : > { %v895_v40 = vpop.permute.xlu0 %894 }
 0x4fb   : > { %v1431_v14 = vpop.eup %1430 }
 0x525   : > { %v677_v15 = vpop.f32.mrf.mxu0 }
 0x526   : > { %v684_v16 = vmul.f32 %v1431_v14, %v677_v15 }
 0x527   : > { %v1281_v18 = vpop.f32.mrf.mxu0 }
 0x528   : > { %v685_v19 = vpack.c.bf16 %v684_v16, %v684_v16 }
 0x529   : > { %v680_v20 = vpop.f32.mrf.mxu0 }
 0x52a   : > { %1286 = vmatmul.mubr.msk.bf16.vlgmr.msra.gmra.mxu1 %vm412_vm3, %v685_v19 }
 0x52b   : > { %1296 = vmatpush3.bf16.msra.mxu1 %v801_v22  ;;  %v1282_v23 = vpop.f32.mrf.mxu0  ;;  %1297 = vmatprep.mubr.msk.bf16.mxu1 %vm1612_vm0, %v1611_v0 }
 0x52c   : > { %1307 = vmatprep.subr.bf16.mxu1 %v1611_v0 }
 0x52d   : > { %v778_v26 = vpop.f32.mrf.mxu0 }
 0x52e   : > { %v784_v27 = vsel %vm402_vm4, %v778_v26, -inf }
 0x52f   : > { %v1293_v28 = vpop.f32.mrf.mxu0  ;;  %v785_v29 = vsel %vm412_vm3, %v784_v27, -inf }
 0x530   : > { %786 = vmax.xlane.f32.xlu1 %v785_v29 }
 0x531   : > { %v781_v30 = vpop.f32.mrf.mxu0 }
 0x533   : > { %v1294_v31 = vpop.f32.mrf.mxu0 }
 0x541   : > { %896 = vrot.lane.b32.xlu1 %v1801_v21, %s1618_s12 }
 0x5b9   : > { %v787_v32 = vpop.xlane.xlu1 %786 }
 0x5ba   : > { %v788_v33 = vsub.f32 %v784_v27, %v787_v32 }
 0x5bc   : > { %v789_v34 = vmul.f32 1.442695, %v788_v33 }
 0x5bd   : > { %v897_v36 = vpop.permute.xlu1 %896 }
 0x5be   : > { %1432 = vpow2.f32 %v789_v34  ;;  %v902_v39 = vsel %vm412_vm3, %v897_v36, 0 }
 0x5cb   : > { %v1433_v35 = vpop.eup %1432 }
 0x5cc   : > { %v791_v37 = vsel %vm412_vm3, %v1433_v35, 0.0  ;;  %v794_v38 = vpack.c.bf16 %v1433_v35, %v1433_v35 }
 0x5cd   : > { %792 = vadd.xlane.f32.xlu1 %v791_v37 }
 0x5ce   : > { %1298 = vmatmul.mubr.msk.bf16.vlgmr.msra.gmra.mxu1 %vm412_vm3, %v794_v38 }
 0x5cf   : > { %1308 = vmatpush3.bf16.xpose.msra.mxu1 %v902_v39  ;;  %1309 = vmatprep.mubr.msk.bf16.mxu1 %vm1612_vm0, %v1611_v0 }
 0x5d0   : > { %1319 = vmatprep.subr.bf16.mxu1 %v1611_v0 }
 0x5d6   : > { %1310 = vmatmul.mubr.msk.bf16.vlgmr.msra.gmra.mxu1 %vm412_vm3, %v895_v40 }
 0x5d7   : > { %1321 = vmatprep.mubr.msk.bf16.mxu1 %vm1612_vm0, %v1611_v0  ;;  %1320 = vmatpush3.bf16.msra.mxu1 %v1011_v7 }
 0x5ea   : > { %v727_v43 = vpop.f32.mrf.mxu1 }
 0x5eb   : > { %v733_v44 = vadd.f32 %v727_v43, %v572_v42 }
 0x5ec   : > { %v1287_v45 = vpop.f32.mrf.mxu1 }
 0x5ee   : > { %v730_v46 = vpop.f32.mrf.mxu1 }
 0x5f0   : > { %v1288_v47 = vpop.f32.mrf.mxu1 }
 0x656   : > { %v793_v50 = vpop.xlane.xlu1 %792 }
 0x657   : > { %1434 = vrcp.f32 %v793_v50 }
 0x664   : > { %v1435_v51 = vpop.eup %1434 }
 0x68e   : > { %v837_v52 = vpop.f32.mrf.mxu1 }
 0x68f   : > { %v844_v53 = vmul.f32 %v1435_v51, %v837_v52 }
 0x690   : > { %v1299_v54 = vpop.f32.mrf.mxu1 }
 0x691   : > { %v845_v55 = vpack.c.bf16 %v844_v53, %v844_v53 }
 0x692   : > { %v840_v56 = vpop.f32.mrf.mxu1 }
 0x693   : > { %1304 = vmatmul.mubr.msk.bf16.vlgmr.msra.gmra.mxu0 %vm412_vm3, %v845_v55 }
 0x694   : > { %v1300_v57 = vpop.f32.mrf.mxu1  ;;  %1315 = vmatprep.mubr.msk.bf16.mxu0 %vm1612_vm0, %v1611_v0 }
 0x696   : > { %v938_v58 = vpop.f32.mrf.mxu1 }
 0x697   : > { %v944_v59 = vsel %vm402_vm4, %v938_v58, -inf }
 0x698   : > { %v1311_v60 = vpop.f32.mrf.mxu1  ;;  %v945_v61 = vsel %vm412_vm3, %v944_v59, -inf }
 0x699   : > { %946 = vmax.xlane.f32.xlu0 %v945_v61 }
 0x69a   : > { %v941_v62 = vpop.f32.mrf.mxu1 }
 0x69c   : > { %v1312_v63 = vpop.f32.mrf.mxu1 }
 0x6af   : > { %955 = vrot.lane.b32.xlu0 %v1801_v21, %s1619_s14 }
 0x722   : > { %v947_v1 = vpop.xlane.xlu0 %946 }
 0x723   : > { %v948_v2 = vsub.f32 %v944_v59, %v947_v1 }
 0x725   : > { %v949_v3 = vmul.f32 1.442695, %v948_v2 }
 0x726   : > { %v956_v4 = vpop.permute.xlu0 %955 }
 0x727   : > { %1436 = vpow2.f32 %v949_v3  ;;  %v961_v0 = vsel %vm478_vm5, %v956_v4, 0 }
 0x728   : > { %1314 = vmatpush3.bf16.msra.mxu0 %v961_v0 }
 0x734   : > { %v1437_v5 = vpop.eup %1436 }
 0x735   : > { %v951_v24 = vsel %vm412_vm3, %v1437_v5, 0.0  ;;  %v954_v25 = vpack.c.bf16 %v1437_v5, %v1437_v5 }
 0x736   : > { %952 = vadd.xlane.f32.xlu1 %v951_v24 }
 0x737   : > { %1316 = vmatmul.mubr.msk.bf16.vlgmr.msra.gmra.mxu0 %vm412_vm3, %v954_v25 }
 0x753   : > { %v887_v21 = vpop.f32.mrf.mxu0 }
 0x754   : > { %v893_v8 = vadd.f32 %v887_v21, %v733_v44 }
 0x755   : > { %v1305_v9 = vpop.f32.mrf.mxu0 }
 0x757   : > { %v890_v10 = vpop.f32.mrf.mxu0 }
 0x759   : > { %v1306_v11 = vpop.f32.mrf.mxu0 }
 0x7bf   : > { %v953_v12 = vpop.xlane.xlu1 %952 }
 0x7c0   : > { %1438 = vrcp.f32 %v953_v12 }
 0x7cd   : > { %v1439_v13 = vpop.eup %1438 }
 0x7f7   : > { %v997_v14 = vpop.f32.mrf.mxu0 }
 0x7f8   : > { %v1004_v15 = vmul.f32 %v1439_v13, %v997_v14 }
 0x7f9   : > { %v1317_v16 = vpop.f32.mrf.mxu0 }
 0x7fa   : > { %v1005_v17 = vpack.c.bf16 %v1004_v15, %v1004_v15 }
 0x7fb   : > { %v1000_v18 = vpop.f32.mrf.mxu0 }
 0x7fc   : > { %1322 = vmatmul.mubr.msk.bf16.vlgmr.msra.gmra.mxu1 %vm412_vm3, %v1005_v17 }
 0x7fd   : > { %v1318_v19 = vpop.f32.mrf.mxu0 }
 0x8bc   : > { %v1047_v20 = vpop.f32.mrf.mxu1 }
 0x8bd   : > { %v1053_v22 = vadd.f32 %v1047_v20, %v893_v8 }
 0x8be   : > { %v1323_v23 = vpop.f32.mrf.mxu1 }
 0x8bf   : > { %1054 = vst.msk [vmem:[%s255_s29] sm:$0xff] %vm283_vm1, %v1053_v22 }
 0x8c0   : > { %v1050_v26 = vpop.f32.mrf.mxu1 }
 0x8c1   : > { %1533 = shalt.err (!%p1530_p5)
}
 0x8c2   : > { %s1534_s11 = scalar_lea.hbm %s1907_s25, 128  ;;  %s1538_s24 = scalar_lea.hbm %s1960_s4, 256 }
 0x8c3   : > { %p1535_p10 = scmp.ne.s32.totalorder %s1907_s25, %s1534_s11  ;;  %p1539_p6 = scmp.lt.s32.totalorder %s1907_s25, %s1960_s4 }
 0x8c4   : > { %p1540_p12 = scmp.lt.s32.totalorder %s1538_s24, %s1534_s11 }
 0x8c5   : > { %p1536_p1 = pnand %p1535_p10, %p1741_p7 }
 0x8c6   : > { %p1541_p3 = por %p1540_p12, %p1539_p6 }
 0x8c7   : > { %p1537_p4 = pneg %p1536_p1 }
 0x8c9   : > { %p1542_p8 = pnand %p1541_p3, %p1537_p4 }
 0x8cb   : > { %1545 = shalt.err (!%p1542_p8)
}
 0x8cc   : > { %1335 = dma.vmem_to_hbm [thread:$0]  (%p1741_p7), %s1909_s6, 128, %s1907_s25, %s1056_s18   ;;  %v1324_v27 = vpop.f32.mrf.mxu1 }
 0x8cd PF: > { %s1082_s22 = sand.u32 1, %s1584_s15   ;;  %p1974_p9 = scmp.ne.s32.totalorder %s1967_s26, 0 }
 0x8ce   : > { %p1975_p11 = scmp.ge.s32.totalorder %s1604_s20, 2  ;;  %s1083_s29 = scalar_lea.sflag [#allocation5], %s1082_s22 }
 0x8d0   : > { %p1349_p2 = pnand %p1975_p11, %p1974_p9 }
 0x8d2   : > { %p1350_p13 = pneg %p1349_p2 }
 0x8d4   : > { %1579 = dma.done.wait (%p1350_p13), %s1083_s29, 128  }
 0x8d5   : > { %1581 = vsyncadd (%p1350_p13), %s1083_s29, 4294967168  ;;  %s21_s20 = sadd.s32 1, %s1604_s20   ;;  %s1976_s15 = smov %s1588_s16 }
 0x8d6   : > { %p18_p0 = scmp.ge.s32.totalorder %s21_s20, 4   ;;  %s1977_s16 = smov %s1592_s17 }
 0x8d7   : > { %s1978_s17 = smov %s1750_s7  ;;  %s1979_s18 = smov %s1600_s19 }
 0x8d8   : > { %s1980_s19 = smov %s1982_s21  ;;  %20 = sbr.rel (!%p18_p0) target bundleno = 7 (0x7), region = 94 }
 0x8dd   :  { %1088 = vsyncpa [#allocation4], 1 }
 0x8de   :  { %1090 = vsyncpa [#allocation4 + $0x1], 1 }
 0x8df   :  { %1091 = vsyncpa [#allocation7], 1 }
 0x8e0   :  { %1092 = vsyncpa [#allocation5], 1 }
 0x8e1   :  { %1094 = vsyncpa [#allocation5 + $0x1], 1 }

</bundles_post_ra>
